<compile_context>
chip_gen: v5e
topology: v5e:2x2
jax: 0.10.0
libtpu: 0.0.40
codegen_flags: <defaults>
</compile_context>

<pallas_src>
import functools

import jax
import jax.numpy as jnp
from jax import lax
from jax.experimental import pallas as pl
from jax.experimental.pallas import tpu as pltpu

_TR_MAX = 1024               # max row-tile height
_TINY_OUT_BYTES = 1 << 20    # below this, fall back to jnp.pad


def _vmem_budgets():
    """(block_budget_bytes, vmem_limit_bytes) tuned per TPU generation."""
    try:
        cap = int(pltpu.get_tpu_info().vmem_capacity_bytes)
    except Exception:
        cap = 64 * 1024 * 1024  # conservative default (v7x per-core VMEM)
    if cap >= 100 * 1024 * 1024:        # v5e / v6e: 128 MiB physical VMEM
        return 48 * 1024 * 1024, 96 * 1024 * 1024
    return 24 * 1024 * 1024, 48 * 1024 * 1024   # v7x: 64 MiB per TensorCore


def _select_blocks(c, s, w, itemsize, budget, tr_max, subl):
    """Pick channel-block cb and row-tile tr so double-buffered in+out blocks
    fit within `budget`, preferring the largest fused blocks."""
    row_bytes = 2 * (s + w) * itemsize          # dbl-buffered in+out, per row, per channel
    tr = min(tr_max, s)
    if tr < s:
        tr = max(subl, (tr // subl) * subl)
    if tr * row_bytes > budget:                 # even cb=1 overflows -> shrink tr
        tr = max(subl, (budget // row_bytes) // subl * subl)
    cb = max(1, min(c, budget // max(1, tr * row_bytes)))
    return cb, tr


def _fill(shape, value, dtype):
    return jnp.full(shape, value, dtype=dtype)


def _pad_right_kernel(x_ref, o_ref, *, w, value):
    """Case S == H (h >= w): pad is a right-hand column strip.

    Fill the whole tile with one unmasked lane-dense store, then overwrite
    columns [0, w) with the image (single masked boundary at col w)."""
    if w < o_ref.shape[-1]:  # static
        o_ref[...] = _fill(o_ref.shape, value, o_ref.dtype)
    o_ref[:, :, :w] = x_ref[...]


def _pad_bottom_rowtiled_kernel(x_ref, o_ref, *, h, tr, value):
    """Case S == W (w > h), deep image (tr <= h), row-tiled.

    Three-way specialization: pure-copy tiles, pure-pad tiles, and the single
    boundary tile that uses a row-index mask (mask discards the undefined
    block-edge rows of the clamped input block)."""
    ri = pl.program_id(1)
    row0 = ri * tr

    @pl.when(row0 + tr <= h)
    def _():  # pure image tile
        o_ref[...] = x_ref[...]

    @pl.when(row0 >= h)
    def _():  # pure pad tile (input block is fetched but ignored)
        o_ref[...] = _fill(o_ref.shape, value, o_ref.dtype)

    @pl.when(jnp.logical_and(row0 < h, row0 + tr > h))
    def _():  # boundary tile
        rows = row0 + lax.broadcasted_iota(jnp.int32, o_ref.shape, 1)
        pad = _fill(o_ref.shape, value, o_ref.dtype)
        o_ref[...] = jnp.where(rows < h, x_ref[...], pad)


def _pad_bottom_shallow_kernel(x_ref, o_ref, *, h, value):
    """Case S == W (w > h), shallow image (h < tr): all image rows live in
    row-tile 0; remaining tiles are pure fill.  Fill first (lane/sublane-dense
    full store), then overwrite the image rows in tile 0."""
    o_ref[...] = _fill(o_ref.shape, value, o_ref.dtype)

    @pl.when(pl.program_id(1) == 0)
    def _():
        o_ref[:, :h, :] = x_ref[...]


def square_pad(
    x: jax.Array,
    value: float,
    *,
    tr_max: int = _TR_MAX,
    force_pallas: bool = False,
) -> jax.Array:
    """Pad a (C, H, W) image to (C, S, S), S = max(H, W), image in top-left."""
    c, h, w = x.shape
    s = max(h, w)
    dtype = x.dtype
    itemsize = jnp.dtype(dtype).itemsize

    # Tiny outputs: fixed pallas_call/step overhead dominates and lane width
    # < 128 forces masked stores everywhere -> let XLA handle (and fuse) it.
    if not force_pallas and (s < 128 or c * s * s * itemsize < _TINY_OUT_BYTES):
        return jnp.pad(
            x, ((0, 0), (0, s - h), (0, s - w)),
            mode="constant", constant_values=jnp.asarray(value, dtype),
        )

    budget, vmem_limit = _vmem_budgets()
    subl = max(8, 32 // itemsize)  # sublane-packing multiple for this dtype

    cb, tr = _select_blocks(c, s, w, itemsize, budget, tr_max, subl)

    # Megacore (v7x has 2 TensorCores): make sure the grid has >= 2 steps.
    if pl.cdiv(c, cb) * pl.cdiv(s, tr) == 1:
        if c >= 2:
            cb = pl.cdiv(c, 2)
        elif s >= 2 * subl:
            tr = ((pl.cdiv(s, 2) + subl - 1) // subl) * subl

    n_c_tiles = pl.cdiv(c, cb)
    n_row_tiles = pl.cdiv(s, tr)

    out_spec = pl.BlockSpec((cb, tr, s), lambda ci, ri: (ci, ri, 0))

    if h >= w:
        # Right pad only: input and output share the same row tiling (S == H).
        in_spec = pl.BlockSpec((cb, tr, w), lambda ci, ri: (ci, ri, 0))
        kernel = functools.partial(_pad_right_kernel, w=w, value=value)
    elif h >= tr:
        # Bottom pad, deep image: row-tiled input; clamp the row-block index
        # so pure-pad tiles still map to a valid (ignored) input block.
        in_blocks = pl.cdiv(h, tr)
        in_spec = pl.BlockSpec(
            (cb, tr, w),
            lambda ci, ri: (ci, jnp.minimum(ri, in_blocks - 1), 0),
        )
        kernel = functools.partial(
            _pad_bottom_rowtiled_kernel, h=h, tr=tr, value=value
        )
    else:
        # Bottom pad, shallow image (h < tr): full-height input block.
        in_spec = pl.BlockSpec((cb, h, w), lambda ci, ri: (ci, 0, 0))
        kernel = functools.partial(_pad_bottom_shallow_kernel, h=h, value=value)

    cost = pl.CostEstimate(
        flops=0,
        transcendentals=0,
        bytes_accessed=c * h * w * itemsize + c * s * s * itemsize,
    )

    return pl.pallas_call(
        kernel,
        out_shape=jax.ShapeDtypeStruct((c, s, s), dtype),
        grid_spec=pltpu.PrefetchScalarGridSpec(
            num_scalar_prefetch=0,
            grid=(n_c_tiles, n_row_tiles),
            in_specs=[in_spec],
            out_specs=out_spec,
        ),
        compiler_params=pltpu.CompilerParams(
            dimension_semantics=("parallel", "parallel"),
            vmem_limit_bytes=vmem_limit,
        ),
        cost_estimate=cost,
    )(x)


def _reference(x, value):
    c, h, w = x.shape
    s = max(h, w)
    return jnp.pad(
        x, ((0, 0), (0, s - h), (0, s - w)),
        mode="constant", constant_values=jnp.asarray(value, x.dtype),
    )


if __name__ == "__main__":
    value = -1.0
    keys = iter(jax.random.split(jax.random.PRNGKey(0), 8))

    def check(shape, dtype=jnp.float32, **kw):
        x = jax.random.normal(next(keys), shape).astype(dtype)
        out = jax.block_until_ready(square_pad(x, value, **kw))
        ref = _reference(x, value)
        assert out.shape == ref.shape and out.dtype == x.dtype
        assert jnp.array_equal(out, ref), f"mismatch for shape {shape} {kw}"

    # Primary small example: default path (tiny -> XLA pad fallback) and the
    # Pallas path forced so the kernel itself is exercised on TPU.
    check((4, 16, 12))
    check((4, 16, 12), force_pallas=True)          # right-pad, channel-split grid

    # Exercise the row-tiled paths with a small forced tile height.
    check((2, 200, 160), tr_max=64, force_pallas=True)  # right-pad, row-tiled
    check((2, 160, 200), tr_max=64, force_pallas=True)  # bottom-pad deep: copy/boundary/pad tiles
    check((2, 40, 200), tr_max=64, force_pallas=True)   # bottom-pad shallow
    check((3, 64, 64), force_pallas=True)               # square (no pad), partial channel block

    print("KERNEL_OK")
</pallas_src>

<mosaic_0001>
module attributes {stable_mosaic.version = 11 : i64} {
  func.func @_pad_right_kernel(%arg0: i32, %arg1: i32, %arg2: memref<2x16x12xf32, #tpu.memory_space<vmem>>, %arg3: memref<2x16x16xf32, #tpu.memory_space<vmem>>) attributes {dimension_semantics = [#tpu.dimension_semantics<parallel>, #tpu.dimension_semantics<parallel>], iteration_bounds = array<i64: 2, 1>, scalar_prefetch = 0 : i64, scratch_operands = 0 : i64, tpu.core_type = #tpu.core_type<tc>, window_params = [{transform_indices = @transform_0, window_bounds = array<i64: 2, 16, 12>}, {transform_indices = @transform_1, window_bounds = array<i64: 2, 16, 16>}]} {
    %cst = arith.constant -1.000000e+00 : f32
    %0 = vector.broadcast %cst : f32 to vector<2x16x16xf32>
    %c0 = arith.constant 0 : index
    %c0_0 = arith.constant 0 : index
    %c0_1 = arith.constant 0 : index
    %1 = vector.load %arg3[%c0, %c0_0, %c0_1] : memref<2x16x16xf32, #tpu.memory_space<vmem>>, vector<2x16x16xf32>
    tpu.vector_store %arg3[%c0, %c0_0, %c0_1], %0 {strides = array<i32>} : memref<2x16x16xf32, #tpu.memory_space<vmem>>, vector<2x16x16xf32>,
    %c0_2 = arith.constant 0 : index
    %c0_3 = arith.constant 0 : index
    %c0_4 = arith.constant 0 : index
    %2 = vector.load %arg2[%c0_2, %c0_3, %c0_4] : memref<2x16x12xf32, #tpu.memory_space<vmem>>, vector<2x16x12xf32>
    %c0_5 = arith.constant 0 : index
    %c0_6 = arith.constant 0 : index
    %c0_7 = arith.constant 0 : index
    %3 = vector.load %arg3[%c0_5, %c0_6, %c0_7] : memref<2x16x16xf32, #tpu.memory_space<vmem>>, vector<2x16x12xf32>
    tpu.vector_store %arg3[%c0_5, %c0_6, %c0_7], %2 {strides = array<i32>} : memref<2x16x16xf32, #tpu.memory_space<vmem>>, vector<2x16x12xf32>,
    return
  }
  func.func @transform_0(%arg0: i32, %arg1: i32) -> (i32, i32, i32) {
    %c0_i32 = arith.constant 0 : i32
    %c0_i32_0 = arith.constant 0 : i32
    return %arg0, %arg1, %c0_i32 : i32, i32, i32
  }
  func.func @transform_1(%arg0: i32, %arg1: i32) -> (i32, i32, i32) {
    %c0_i32 = arith.constant 0 : i32
    %c0_i32_0 = arith.constant 0 : i32
    return %arg0, %arg1, %c0_i32 : i32, i32, i32
  }
}

</mosaic_0001>

<bundles_post_ra>
// kernel: tpu_custom_call.1
= control target key start
LH: loop header
LB: loop body
LE: loop exit
PB: predicated region body
PF: predicated region fallthrough
CT: control target
= control target key end

     0   :  { %6 = vsyncpa [#allocation3], 0  ;;  %s529_s0 = inlined_call_operand.vmem [shape: f32[4,16,12], index: 0, kind: input, shape index: {}]   ;;  %s530_s1 = inlined_call_operand.hbm [shape: f32[4,16,16], index: 1, kind: output, shape index: {}]  }
   0x1   :  { %8 = vsyncpa [#allocation3 + $0x1], 0  ;;  %s433_s6 = smov 0   ;;  %s435_s7 = smov 0  }
   0x2   :  { %s437_s8 = smov 0   ;;  %s439_s9 = smov 0  }
   0x3   :  { %s441_s10 = smov 0   ;;  %s443_s11 = smov 0  }
   0x4 LB: > { %s264_s12 = sadd.s32 4294967295, %s418_s11   ;;  %s265_s13 = sadd.s32 4294967294, %s418_s11   ;;  %s418_s11 = sphi %s443_s11, %s14_s11   ;;  %s414_s10 = sphi %s441_s10, %s537_s10   ;;  %s410_s9 = sphi %s439_s9, %s536_s9   ;;  %s406_s8 = sphi %s437_s8, %s535_s8   ;;  %s402_s7 = sphi %s435_s7, %s534_s7   ;;  %s398_s6 = sphi %s433_s6, %s533_s6  }
   0x5   : > { %s26_s14 = sadd.s32 1, %s414_s10  ;;  %s63_s15 = sadd.s32 1, %s406_s8 }
   0x6   : > { %p28_p0 = scmp.ge.s32.totalorder %s26_s14, 2  ;;  %p73_p1 = scmp.ne.s32.totalorder %s406_s8, %s402_s7 }
   0x7   : > { %p74_p2 = scmp.eq.s32.totalorder %s264_s12, 1  ;;  %p79_p3 = scmp.ne.s32.totalorder %s402_s7, %s398_s6 }
   0x8   : > { %s539_s14 = smov (%p28_p0, %s26_s14), 0  ;;  %p80_p5 = scmp.eq.s32.totalorder %s265_s13, 1 }
   0x9   : > { %p473_p4 = por %p74_p2, %p73_p1  ;;  %s58_s17 = ssub.s32 %s414_s10, %s539_s14 }
   0xa   : > { %p268_p6 = scmp.ge.s32.totalorder %s418_s11, 1  ;;  %p61_p7 = scmp.eq.s32.totalorder %s58_s17, 0 }
   0xb   : > { %p480_p8 = por %p80_p5, %p79_p3  ;;  %p113_p9 = scmp.lt.s32.totalorder %s418_s11, 3 }
   0xc   : > { %s486_s19 = scalar_select %p61_p7, %s406_s8, %s63_s15  }
   0xd   : > { %p114_p10 = pnand %p268_p6, %p113_p9 }
   0xe   : > { %s135_s20 = sand.u32 (!%p114_p10), 1, %s402_s7   ;;  %s270_s21 = sshll.u32 (!%p114_p10), %s410_s9, 1 }
   0xf   : > { %117 = sbr.rel (%p114_p10) target bundleno = 33 (0x21), region = 24  ;;  %s269_s22 = sshll.u32 (!%p114_p10), %s135_s20, 5 }
  0x10   : > { %p140_p11 = scmp.lt.s32.totalorder (!%p114_p10), %s270_s21, 3  ;;  %s137_s23 = scalar_lea.vmem (!%p114_p10), [#allocation2], %s269_s22 }
  0x11   : > { %s281_s24 = sshll.u32 (!%p114_p10), %s410_s9, 5  ;;  %s182_s25 = sshll.u32 (!%p114_p10), %s137_s23, 4  ;;  %s183_s25 = int_to_ptr.vmem [resolvable:$true] %s182_s25 }
  0x12   : > { %s181_s29 = scalar_lea.hbm (!%p114_p10), %s530_s1, %s281_s24  ;;  %s167_s5 = scalar_lea.sflag (!%p114_p10), [#allocation3], %s135_s20 }
  0x13   : > { %s184_s4 = sshll.u32 (!%p114_p10), %s181_s29, 4  ;;  %s360_s17 = scalar_lea.hbm (!%p114_p10), %s530_s1, 64  ;;  %s185_s4 = int_to_ptr.hbm [resolvable:$true] %s184_s4 }
  0x14   : > { %vm152_vm0 = vcmask 130048   ;;  %v420_v0 = vmov -1.0   ;;  %s541_s21 = smov (!%p140_p11, %s270_s21), 3  ;;  %vm161_vm1 = vcmask 97280   ;;  %s354_s9 = sshra.s32 %s185_s4, 4  ;;  %s355_s9 = int_to_ptr.hbm [resolvable:$true] %s354_s9 }
  0x15   : > { %153 = vst.msk [vmem:[%s137_s23] sm:$0xff] %vm152_vm0, %v420_v0  ;;  %s279_s26 = sshll.u32 %s541_s21, 4  ;;  %s356_s12 = scalar_lea.hbm %s355_s9, 32 }
  0x16   : > { %154 = vst.msk [vmem:[%s137_s23 + $0x8] sm:$0xff] %vm152_vm0, %v420_v0  ;;  %s147_s3 = scalar_lea.vmem %s529_s0, %s279_s26  ;;  %p357_p12 = scmp.ne.s32.totalorder %s355_s9, %s356_s12 }
  0x17   : > { %155 = vst.msk [vmem:[%s137_s23 + $0x10] sm:$0xff] %vm152_vm0, %v420_v0  ;;  %v157_v1 = vld [vmem:[%s147_s3] sm:$0xff]  ;;  %v158_v2 = vld [vmem:[%s147_s3 + $0x8] sm:$0xff]  ;;  %v159_v3 = vld [vmem:[%s147_s3 + $0x10] sm:$0xff]  ;;  %p361_p1 = scmp.lt.s32.totalorder %s355_s9, %s530_s1  ;;  %p362_p2 = scmp.lt.s32.totalorder %s360_s17, %s356_s12 }
  0x18   : > { %156 = vst.msk [vmem:[%s137_s23 + $0x18] sm:$0xff] %vm152_vm0, %v420_v0  ;;  %v160_v4 = vld [vmem:[%s147_s3 + $0x18] sm:$0xff]  ;;  %p358_p13 = pnand %p357_p12, %p473_p4 }
  0x19   : > { %162 = vst.msk [vmem:[%s137_s23] sm:$0xff] %vm161_vm1, %v157_v1  ;;  %p363_p3 = por %p362_p2, %p361_p1 }
  0x1a   : > { %163 = vst.msk [vmem:[%s137_s23 + $0x8] sm:$0xff] %vm161_vm1, %v158_v2  ;;  %p359_p0 = pneg %p358_p13 }
  0x1b   : > { %164 = vst.msk [vmem:[%s137_s23 + $0x10] sm:$0xff] %vm161_vm1, %v159_v3 }
  0x1c   : > { %165 = vst.msk [vmem:[%s137_s23 + $0x18] sm:$0xff] %vm161_vm1, %v160_v4  ;;  %p364_p5 = pnand %p363_p3, %p359_p0 }
  0x1e   : > { %367 = shalt.err (!%p364_p5)
}
  0x1f   : > { %s421_s20 = smov 128   ;;  %s422_s23 = smov 8  }
  0x20   : > { %282 = dma.vmem_to_hbm [thread:$0]  (%p473_p4), %s183_s25, 512, %s185_s4, %s167_s5, %s421_s20, %s421_s20, %s422_s23  }
  0x21 PF: > { %p288_p6 = scmp.ge.s32.totalorder %s418_s11, 2  ;;  %s199_s24 = sand.u32 1, %s398_s6  }
  0x22   : > { %s200_s26 = scalar_lea.sflag [#allocation3], %s199_s24 }
  0x23   : > { %p285_p7 = pnand %p288_p6, %p480_p8 }
  0x25   : > { %p286_p9 = pneg %p285_p7 }
  0x27   : > { %393 = dma.done.wait (%p286_p9), %s200_s26, 512  }
  0x28   : > { %395 = vsyncadd (%p286_p9), %s200_s26, 4294966784  ;;  %s14_s11 = sadd.s32 1, %s418_s11   ;;  %s533_s6 = smov %s402_s7 }
  0x29   : > { %p11_p10 = scmp.ge.s32.totalorder %s14_s11, 4   ;;  %s534_s7 = smov %s406_s8 }
  0x2a   : > { %s535_s8 = smov %s486_s19  ;;  %s536_s9 = smov %s414_s10 }
  0x2b   : > { %s537_s10 = smov %s539_s14  ;;  %13 = sbr.rel (!%p11_p10) target bundleno = 4 (0x4), region = 59 }
  0x30   :  { %206 = vsyncpa [#allocation3], 1 }
  0x31   :  { %208 = vsyncpa [#allocation3 + $0x1], 1 }

</bundles_post_ra>
